<compile_context>
chip_gen: v7x
topology: tpu7x:2x2x1
jax: 0.10.0
libtpu: 0.0.40
codegen_flags: <defaults>
</compile_context>

<pallas_src>
import jax
import jax.numpy as jnp
from jax.experimental import pallas as pl
from jax.experimental.pallas import tpu as pltpu

HEAD_PAD = 128   # lane-dense packed head output width (one full vreg lane row)
HALF_PAD = 64    # mean occupies lanes [0, 64), std occupies lanes [64, 128)


def attr_decoder_kernel(x_ref,
                        w1_ref, b1_ref,
                        w2_ref, b2_ref,
                        wh_ref, bh_ref,
                        out_ref):
    # ---- Layer 1: single K=2*h_dim bf16 matmul (f32 accumulate) + bias + ReLU ----
    a1 = jnp.dot(x_ref[...], w1_ref[...],
                 preferred_element_type=jnp.float32) + b1_ref[...]
    a1 = jnp.maximum(a1, 0.0)

    # ---- Layer 2: Linear -> ReLU (bf16 MXU operands, f32 accumulate) ----
    dec = jnp.dot(a1.astype(jnp.bfloat16), w2_ref[...],
                  preferred_element_type=jnp.float32) + b2_ref[...]
    dec = jnp.maximum(dec, 0.0)                              # (TILE_N, attr_hid_dim)

    # ---- Fused heads: ONE matmul into a lane-dense 128-wide packed output ----
    s = jnp.dot(dec.astype(jnp.bfloat16), wh_ref[...],
                preferred_element_type=jnp.float32) + bh_ref[...]
    lane = jax.lax.broadcasted_iota(jnp.int32, s.shape, dimension=1)
    mean_part = jnp.maximum(s, 0.0)          # ReLU     (no_neg=True)  -> VPU
    std_part = jnp.logaddexp(s, 0.0)         # Softplus (stable)       -> EUP slot
    out_ref[...] = jnp.where(lane < HALF_PAD, mean_part, std_part)


def attr_decoder_forward(phi_z_t, h, params, *, tile_n=1024):
    """phi_z_t: (N, h_dim), h: (N, h_dim). Returns (mean, std) each (N, x_dim), f32."""
    N, h_dim = phi_z_t.shape
    attr_hid = params["w2"].shape[0]
    x_dim = params["wm"].shape[1]
    assert x_dim <= HALF_PAD, "x_dim must fit in one 64-lane half of the packed head"

    # ---- host-side prep (one-time layout/precision plumbing, not compute) ----
    # single concat outside the hot kernel loop -> one K=2*h_dim layer-1 dot
    x = jnp.concatenate([phi_z_t, h], axis=1).astype(jnp.bfloat16)   # (N, 2*h_dim)
    w1 = params["w1"].astype(jnp.bfloat16)                           # (2*h_dim, attr_hid)
    w2 = params["w2"].astype(jnp.bfloat16)                           # (attr_hid, attr_hid)
    wh = jnp.zeros((attr_hid, HEAD_PAD), jnp.float32)
    wh = wh.at[:, :x_dim].set(params["wm"]).at[:, HALF_PAD:HALF_PAD + x_dim].set(params["ws"])
    wh = wh.astype(jnp.bfloat16)
    bh = jnp.zeros((1, HEAD_PAD), jnp.float32)
    bh = bh.at[:, :x_dim].set(params["bm"]).at[:, HALF_PAD:HALF_PAD + x_dim].set(params["bs"])

    # ---- row tiling: no host-side padding copy ----
    # If everything fits in one tile, use a single full-array block (allowed even
    # when N is not a multiple of 8: block dim == full array dim).  Otherwise use
    # tile_n rows per step (multiple of 8); the ragged final block reads garbage
    # tail rows and its writeback is masked.
    if N <= tile_n:
        tile_n = N
    else:
        tile_n = max(8, (tile_n // 8) * 8)
    grid = (pl.cdiv(N, tile_n),)

    row_spec = lambda d: pl.BlockSpec((tile_n, d), lambda i: (i, 0))
    full_spec = lambda a: pl.BlockSpec(a.shape, lambda i: (0, 0))   # weights stay resident

    out = pl.pallas_call(
        attr_decoder_kernel,
        out_shape=jax.ShapeDtypeStruct((N, HEAD_PAD), jnp.float32),
        grid=grid,
        in_specs=[
            row_spec(2 * h_dim),
            full_spec(w1), full_spec(params["b1"]),
            full_spec(w2), full_spec(params["b2"]),
            full_spec(wh), full_spec(bh),
        ],
        out_specs=row_spec(HEAD_PAD),
        compiler_params=pltpu.CompilerParams(dimension_semantics=("parallel",)),
    )(x, w1, params["b1"], w2, params["b2"], wh, bh)

    # TODO(synk): consumers that accept the packed (N,128) layout (mean lanes
    # [0,x_dim), std lanes [64,64+x_dim)) can skip these two strided slices.
    mean = out[:, :x_dim]
    std = out[:, HALF_PAD:HALF_PAD + x_dim]
    return mean, std


def init_params(key, h_dim, attr_hid_dim, x_dim):
    """Deterministic synthetic parameter init (shapes match the PyTorch module)."""
    ks = jax.random.split(key, 8)
    def lin(kw, kb, fin, fout):
        # uniform(-1/sqrt(fin), 1/sqrt(fin)) like torch.nn.Linear default
        bound = 1.0 / jnp.sqrt(jnp.float32(fin))
        w = jax.random.uniform(kw, (fin, fout), jnp.float32, -bound, bound)
        b = jax.random.uniform(kb, (1, fout), jnp.float32, -bound, bound)
        return w, b
    w1, b1 = lin(ks[0], ks[1], 2 * h_dim, attr_hid_dim)
    w2, b2 = lin(ks[2], ks[3], attr_hid_dim, attr_hid_dim)
    wm, bm = lin(ks[4], ks[5], attr_hid_dim, x_dim)
    ws, bs = lin(ks[6], ks[7], attr_hid_dim, x_dim)
    return dict(w1=w1, b1=b1, w2=w2, b2=b2, wm=wm, bm=bm, ws=ws, bs=bs)


def attr_decoder_ref_f32(phi_z_t, h, p):
    """Pure-JAX f32 reference of the PyTorch forward (semantic check, loose tol)."""
    x = jnp.concatenate([phi_z_t, h], axis=1)
    a1 = jax.nn.relu(x @ p["w1"] + p["b1"])
    dec = jax.nn.relu(a1 @ p["w2"] + p["b2"])
    mean = jax.nn.relu(dec @ p["wm"] + p["bm"])
    std = jax.nn.softplus(dec @ p["ws"] + p["bs"])
    return mean, std


def attr_decoder_ref_mixed(phi_z_t, h, p):
    """Pure-JAX reference with the same bf16-operand / f32-accumulate recipe."""
    bf = jnp.bfloat16
    f32 = jnp.float32
    x = jnp.concatenate([phi_z_t, h], axis=1).astype(bf)
    a1 = jax.nn.relu(jnp.dot(x, p["w1"].astype(bf), preferred_element_type=f32) + p["b1"])
    dec = jax.nn.relu(jnp.dot(a1.astype(bf), p["w2"].astype(bf),
                              preferred_element_type=f32) + p["b2"])
    mean = jax.nn.relu(jnp.dot(dec.astype(bf), p["wm"].astype(bf),
                               preferred_element_type=f32) + p["bm"])
    std = jax.nn.softplus(jnp.dot(dec.astype(bf), p["ws"].astype(bf),
                                  preferred_element_type=f32) + p["bs"])
    return mean, std


if __name__ == "__main__":
    key = jax.random.PRNGKey(0)

    # ---- case 1: small shapes (N nodes, hidden dims) ----
    N, h_dim, attr_hid_dim, x_dim = 8, 32, 32, 16
    k_phi, k_h, k_adj, k_params = jax.random.split(key, 4)
    phi_z_t = jax.random.normal(k_phi, (N, h_dim), jnp.float32)
    h = jax.random.normal(k_h, (N, h_dim), jnp.float32)
    # gen_A_t is unused in the 'mlp' decoding path (only consumed by the GNN branch)
    gen_A_t = (jax.random.uniform(k_adj, (N, N)) > 0.5).astype(jnp.float32)
    params = init_params(k_params, h_dim, attr_hid_dim, x_dim)

    mean, std = attr_decoder_forward(phi_z_t, h, params)
    jax.block_until_ready((mean, std))
    assert mean.shape == (N, x_dim) and std.shape == (N, x_dim)

    # tight check vs. the same mixed-precision recipe (implementation correctness)
    mean_m, std_m = attr_decoder_ref_mixed(phi_z_t, h, params)
    assert jnp.allclose(mean, mean_m, atol=1e-4, rtol=1e-4)
    assert jnp.allclose(std, std_m, atol=1e-4, rtol=1e-4)
    # loose check vs. full-f32 math (semantic fidelity to the PyTorch forward)
    mean_f, std_f = attr_decoder_ref_f32(phi_z_t, h, params)
    assert jnp.allclose(mean, mean_f, atol=3e-2, rtol=3e-2)
    assert jnp.allclose(std, std_f, atol=3e-2, rtol=3e-2)

    # ---- case 2: ragged multi-step grid (N not a tile multiple, no host pad) ----
    N2 = 300
    k_phi2, k_h2 = jax.random.split(jax.random.PRNGKey(1))
    phi2 = jax.random.normal(k_phi2, (N2, h_dim), jnp.float32)
    h2 = jax.random.normal(k_h2, (N2, h_dim), jnp.float32)

    mean2, std2 = attr_decoder_forward(phi2, h2, params, tile_n=128)   # 3 steps, masked tail
    mean3, std3 = attr_decoder_forward(phi2, h2, params)               # single 300-row block
    jax.block_until_ready((mean2, std2, mean3, std3))

    m2r, s2r = attr_decoder_ref_mixed(phi2, h2, params)
    assert jnp.allclose(mean2, m2r, atol=1e-4, rtol=1e-4)
    assert jnp.allclose(std2, s2r, atol=1e-4, rtol=1e-4)
    assert jnp.allclose(mean3, m2r, atol=1e-4, rtol=1e-4)
    assert jnp.allclose(std3, s2r, atol=1e-4, rtol=1e-4)

    m2f, s2f = attr_decoder_ref_f32(phi2, h2, params)
    assert jnp.allclose(mean2, m2f, atol=3e-2, rtol=3e-2)
    assert jnp.allclose(std2, s2f, atol=3e-2, rtol=3e-2)

    print("KERNEL_OK")
</pallas_src>

<mosaic_0001>
module attributes {stable_mosaic.version = 11 : i64} {
  func.func @attr_decoder_kernel(%arg0: i32, %arg1: memref<8x64xbf16, #tpu.memory_space<vmem>>, %arg2: memref<64x32xbf16, #tpu.memory_space<vmem>>, %arg3: memref<1x32xf32, #tpu.memory_space<vmem>>, %arg4: memref<32x32xbf16, #tpu.memory_space<vmem>>, %arg5: memref<1x32xf32, #tpu.memory_space<vmem>>, %arg6: memref<32x128xbf16, #tpu.memory_space<vmem>>, %arg7: memref<1x128xf32, #tpu.memory_space<vmem>>, %arg8: memref<8x128xf32, #tpu.memory_space<vmem>>) attributes {dimension_semantics = [#tpu.dimension_semantics<parallel>], iteration_bounds = array<i64: 1>, scalar_prefetch = 0 : i64, scratch_operands = 0 : i64, tpu.core_type = #tpu.core_type<tc>, window_params = [{transform_indices = @transform_0, window_bounds = array<i64: 8, 64>}, {pipeline_mode = #tpu.pipeline_mode<synchronous>, transform_indices = @transform_1, window_bounds = array<i64: 64, 32>}, {pipeline_mode = #tpu.pipeline_mode<synchronous>, transform_indices = @transform_2, window_bounds = array<i64: 1, 32>}, {pipeline_mode = #tpu.pipeline_mode<synchronous>, transform_indices = @transform_3, window_bounds = array<i64: 32, 32>}, {pipeline_mode = #tpu.pipeline_mode<synchronous>, transform_indices = @transform_4, window_bounds = array<i64: 1, 32>}, {pipeline_mode = #tpu.pipeline_mode<synchronous>, transform_indices = @transform_5, window_bounds = array<i64: 32, 128>}, {pipeline_mode = #tpu.pipeline_mode<synchronous>, transform_indices = @transform_6, window_bounds = array<i64: 1, 128>}, {transform_indices = @transform_7, window_bounds = array<i64: 8, 128>}]} {
    %c0 = arith.constant 0 : index
    %c0_0 = arith.constant 0 : index
    %0 = vector.load %arg1[%c0, %c0_0] : memref<8x64xbf16, #tpu.memory_space<vmem>>, vector<8x64xbf16>
    %c0_1 = arith.constant 0 : index
    %c0_2 = arith.constant 0 : index
    %1 = vector.load %arg2[%c0_1, %c0_2] : memref<64x32xbf16, #tpu.memory_space<vmem>>, vector<64x32xbf16>
    %cst = arith.constant dense<0.000000e+00> : vector<8x32xf32>
    %2 = tpu.matmul %0, %1, %cst {dimension_numbers = #tpu.dot_dimension_numbers<[1], [0], [0], [1], [0, 0, 1, 1], [], []>} : vector<8x64xbf16>, vector<64x32xbf16>, vector<8x32xf32> -> vector<8x32xf32>
    %c0_3 = arith.constant 0 : index
    %c0_4 = arith.constant 0 : index
    %3 = vector.load %arg3[%c0_3, %c0_4] : memref<1x32xf32, #tpu.memory_space<vmem>>, vector<1x32xf32>
    %4 = vector.broadcast %3 : vector<1x32xf32> to vector<8x32xf32>
    %5 = arith.addf %2, %4 : vector<8x32xf32>
    %cst_5 = arith.constant 0.000000e+00 : f32
    %6 = vector.broadcast %cst_5 : f32 to vector<8x32xf32>
    %7 = arith.maximumf %5, %6 : vector<8x32xf32>
    %8 = arith.truncf %7 : vector<8x32xf32> to vector<8x32xbf16>
    %c0_6 = arith.constant 0 : index
    %c0_7 = arith.constant 0 : index
    %9 = vector.load %arg4[%c0_6, %c0_7] : memref<32x32xbf16, #tpu.memory_space<vmem>>, vector<32x32xbf16>
    %cst_8 = arith.constant dense<0.000000e+00> : vector<8x32xf32>
    %10 = tpu.matmul %8, %9, %cst_8 {dimension_numbers = #tpu.dot_dimension_numbers<[1], [0], [0], [1], [0, 0, 1, 1], [], []>} : vector<8x32xbf16>, vector<32x32xbf16>, vector<8x32xf32> -> vector<8x32xf32>
    %c0_9 = arith.constant 0 : index
    %c0_10 = arith.constant 0 : index
    %11 = vector.load %arg5[%c0_9, %c0_10] : memref<1x32xf32, #tpu.memory_space<vmem>>, vector<1x32xf32>
    %12 = vector.broadcast %11 : vector<1x32xf32> to vector<8x32xf32>
    %13 = arith.addf %10, %12 : vector<8x32xf32>
    %cst_11 = arith.constant 0.000000e+00 : f32
    %14 = vector.broadcast %cst_11 : f32 to vector<8x32xf32>
    %15 = arith.maximumf %13, %14 : vector<8x32xf32>
    %16 = arith.truncf %15 : vector<8x32xf32> to vector<8x32xbf16>
    %c0_12 = arith.constant 0 : index
    %c0_13 = arith.constant 0 : index
    %17 = vector.load %arg6[%c0_12, %c0_13] : memref<32x128xbf16, #tpu.memory_space<vmem>>, vector<32x128xbf16>
    %cst_14 = arith.constant dense<0.000000e+00> : vector<8x128xf32>
    %18 = tpu.matmul %16, %17, %cst_14 {dimension_numbers = #tpu.dot_dimension_numbers<[1], [0], [0], [1], [0, 0, 1, 1], [], []>} : vector<8x32xbf16>, vector<32x128xbf16>, vector<8x128xf32> -> vector<8x128xf32>
    %c0_15 = arith.constant 0 : index
    %c0_16 = arith.constant 0 : index
    %19 = vector.load %arg7[%c0_15, %c0_16] : memref<1x128xf32, #tpu.memory_space<vmem>>, vector<1x128xf32>
    %20 = vector.broadcast %19 : vector<1x128xf32> to vector<8x128xf32>
    %21 = arith.addf %18, %20 : vector<8x128xf32>
    %22 = tpu.iota {dimensions = array<i32: 1>} : vector<8x128xi32>
    %cst_17 = arith.constant 0.000000e+00 : f32
    %23 = vector.broadcast %cst_17 : f32 to vector<8x128xf32>
    %24 = arith.maximumf %21, %23 : vector<8x128xf32>
    %cst_18 = arith.constant 0.000000e+00 : f32
    %25 = vector.broadcast %cst_18 : f32 to vector<8x128xf32>
    %26 = arith.maximumf %21, %25 : vector<8x128xf32>
    %27 = vector.broadcast %cst_18 : f32 to vector<8x128xf32>
    %28 = arith.subf %21, %27 : vector<8x128xf32>
    %29 = arith.cmpf one, %28, %28 : vector<8x128xf32>
    %30 = vector.broadcast %cst_18 : f32 to vector<8x128xf32>
    %31 = arith.addf %21, %30 : vector<8x128xf32>
    %32 = math.absf %28 : vector<8x128xf32>
    %cst_19 = arith.constant 0.000000e+00 : f32
    %33 = vector.broadcast %cst_19 : f32 to vector<8x128xf32>
    %34 = arith.subf %33, %32 : vector<8x128xf32>
    %35 = math.exp %34 : vector<8x128xf32>
    %36 = math.log1p %35 : vector<8x128xf32>
    %37 = arith.addf %26, %36 : vector<8x128xf32>
    %38 = arith.select %29, %31, %37 : vector<8x128xi1>, vector<8x128xf32>
    %c64_i32 = arith.constant 64 : i32
    %39 = vector.broadcast %c64_i32 : i32 to vector<8x128xi32>
    %40 = arith.cmpi slt, %22, %39 : vector<8x128xi32>
    %41 = arith.select %40, %24, %38 : vector<8x128xi1>, vector<8x128xf32>
    %c0_20 = arith.constant 0 : index
    %c0_21 = arith.constant 0 : index
    %42 = vector.load %arg8[%c0_20, %c0_21] : memref<8x128xf32, #tpu.memory_space<vmem>>, vector<8x128xf32>
    tpu.vector_store %arg8[%c0_20, %c0_21], %41 {strides = array<i32>} : memref<8x128xf32, #tpu.memory_space<vmem>>, vector<8x128xf32>,
    return
  }
  func.func @transform_0(%arg0: i32) -> (i32, i32) {
    %c0_i32 = arith.constant 0 : i32
    %c0_i32_0 = arith.constant 0 : i32
    return %arg0, %c0_i32 : i32, i32
  }
  func.func @transform_1(%arg0: i32) -> (i32, i32) {
    %c0_i32 = arith.constant 0 : i32
    %c0_i32_0 = arith.constant 0 : i32
    %c0_i32_1 = arith.constant 0 : i32
    return %c0_i32, %c0_i32_0 : i32, i32
  }
  func.func @transform_2(%arg0: i32) -> (i32, i32) {
    %c0_i32 = arith.constant 0 : i32
    %c0_i32_0 = arith.constant 0 : i32
    %c0_i32_1 = arith.constant 0 : i32
    return %c0_i32, %c0_i32_0 : i32, i32
  }
  func.func @transform_3(%arg0: i32) -> (i32, i32) {
    %c0_i32 = arith.constant 0 : i32
    %c0_i32_0 = arith.constant 0 : i32
    %c0_i32_1 = arith.constant 0 : i32
    return %c0_i32, %c0_i32_0 : i32, i32
  }
  func.func @transform_4(%arg0: i32) -> (i32, i32) {
    %c0_i32 = arith.constant 0 : i32
    %c0_i32_0 = arith.constant 0 : i32
    %c0_i32_1 = arith.constant 0 : i32
    return %c0_i32, %c0_i32_0 : i32, i32
  }
  func.func @transform_5(%arg0: i32) -> (i32, i32) {
    %c0_i32 = arith.constant 0 : i32
    %c0_i32_0 = arith.constant 0 : i32
    %c0_i32_1 = arith.constant 0 : i32
    return %c0_i32, %c0_i32_0 : i32, i32
  }
  func.func @transform_6(%arg0: i32) -> (i32, i32) {
    %c0_i32 = arith.constant 0 : i32
    %c0_i32_0 = arith.constant 0 : i32
    %c0_i32_1 = arith.constant 0 : i32
    return %c0_i32, %c0_i32_0 : i32, i32
  }
  func.func @transform_7(%arg0: i32) -> (i32, i32) {
    %c0_i32 = arith.constant 0 : i32
    %c0_i32_0 = arith.constant 0 : i32
    return %arg0, %c0_i32 : i32, i32
  }
}

</mosaic_0001>

<bundles_post_ra>
// kernel: tpu_custom_call.1
= control target key start
LH: loop header
LB: loop body
LE: loop exit
PB: predicated region body
PF: predicated region fallthrough
CT: control target
= control target key end

     0   :  { %v378_v1 = vmov 0.0   ;;  %vm379_vm0 = vmmov 0   ;;  %s474_s0 = inlined_call_operand.vmem [shape: bf16[8,64], index: 0, kind: input, shape index: {}]   ;;  %s475_s1 = inlined_call_operand.vmem [shape: bf16[64,32], index: 1, kind: input, shape index: {}]   ;;  %s476_s2 = inlined_call_operand.vmem [shape: f32[1,32], index: 2, kind: input, shape index: {}]   ;;  %s477_s3 = inlined_call_operand.vmem [shape: bf16[32,32], index: 3, kind: input, shape index: {}]   ;;  %s478_s4 = inlined_call_operand.vmem [shape: f32[1,32], index: 4, kind: input, shape index: {}]   ;;  %s479_s5 = inlined_call_operand.vmem [shape: bf16[32,128], index: 5, kind: input, shape index: {}]   ;;  %s480_s6 = inlined_call_operand.vmem [shape: f32[1,128], index: 6, kind: input, shape index: {}]   ;;  %s481_s7 = inlined_call_operand.hbm [shape: f32[8,128], index: 7, kind: output, shape index: {}]  }
   0x1   :  { %v342_v0 = vld [vmem:[%s475_s1] sm:$0xff]   ;;  %311 = vmatprep.subr.bf16.mxu0 %v378_v1  ;;  %323 = vmatprep.subr.bf16.mxu1 %v378_v1  ;;  %v343_v2 = vld [vmem:[%s475_s1 + $0x8] sm:$0xff]   ;;  %v344_v3 = vld [vmem:[%s475_s1 + $0x10] sm:$0xff]  }
   0x2   :  { %312 = vmatpush3.bf16.msra.mxu0 %v342_v0  ;;  %319 = vmatprep.mubr.msk.bf16.mxu0 %vm379_vm0, %v378_v1 }
   0x3   :  { %313 = vmatprep.subr.bf16.mxu0 %v378_v1  ;;  %327 = vmatprep.mubr.msk.bf16.mxu1 %vm379_vm0, %v378_v1 }
   0x6   :  { %314 = vmatpush3.bf16.msra.mxu0 %v343_v2 }
   0x7   :  { %315 = vmatprep.subr.bf16.mxu0 %v378_v1 }
   0x8   :  { %12 = vsyncpa [#allocation3], 0  ;;  %v345_v4 = vld [vmem:[%s475_s1 + $0x18] sm:$0xff]   ;;  %v28_v5 = vld [vmem:[%s474_s0] sm:$0xf]  ;;  %vm68_vm1 = vcmask 523264   ;;  %v249_v38 = vlaneseq }
   0x9   :  { %v346_v6 = vld [vmem:[%s477_s3] sm:$0xff]   ;;  %v347_v7 = vld [vmem:[%s477_s3 + $0x8] sm:$0xff]   ;;  %vm137_vm2 = vcmask 261120  }
   0xa   :  { %316 = vmatpush3.bf16.msra.mxu0 %v344_v3  ;;  %324 = vmatpush3.bf16.msra.mxu1 %v346_v6  ;;  %v286_v8 = vld [vmem:[%s476_s2] ss:$0 sm:$0xff]  ;;  %v349_v17 = vld [vmem:[%s479_s5 + $0x8] sm:$0xff]   ;;  %v250_v42 = vand.u32 127, %v249_v38 }
   0xb   :  { %317 = vmatprep.subr.bf16.mxu0 %v378_v1  ;;  %325 = vmatprep.subr.bf16.mxu1 %v378_v1  ;;  %v348_v15 = vld [vmem:[%s479_s5] sm:$0xff]  }
   0xc   :  { %v292_v18 = vld [vmem:[%s478_s4] ss:$0 sm:$0xff]  ;;  %s380_s4 = smov [#allocation2]   ;;  %vm269_vm4 = vcmp.lt.s32.totalorder %v250_v42, 64 }
   0xd   :  { %v296_v26 = vld [vmem:[%s480_s6] ss:$0 sm:$0xff]  ;;  %s278_s5 = sshll.u32 %s380_s4, 4  ;;  %s279_s5 = int_to_ptr.vmem [resolvable:$true] %s278_s5 }
   0xe   :  { %318 = vmatpush3.bf16.msra.mxu0 %v345_v4  ;;  %326 = vmatpush3.bf16.msra.mxu1 %v347_v7  ;;  %s354_s6 = scalar_lea.vmem %s279_s5, 128  ;;  %p359_p1 = scmp.lt.s32.totalorder %s279_s5, %s279_s5 }
   0xf   :  { %331 = vmatprep.subr.bf16.mxu1 %v378_v1  ;;  %p355_p0 = scmp.ne.s32.totalorder %s279_s5, %s354_s6  ;;  %p360_p2 = scmp.lt.s32.totalorder %s354_s6, %s354_s6 }
  0x11   :  { %320 = vmatmul.mubr.msk.bf16.vlgmr.msra.gmra.mrb[0].mxu0 %vm68_vm1, %v28_v5  ;;  %p361_p3 = por %p360_p2, %p359_p1 }
  0x13   :  { %p362_p4 = pnand %p361_p3, %p355_p0 }
  0xe4   :  { %v106_v9 = vpop.f32.mrb[0].mxu0 }
  0xe5   :  { %v107_v10 = vadd.f32 %v286_v8, %v106_v9  ;;  %v321_v11 = vpop.f32.mrb[1].mxu0 }
  0xe6   :  { %v109_v12 = vpop.f32.mrb[2].mxu0 }
  0xe7   :  { %v112_v13 = vmax.f32 %v107_v10, 0.0  ;;  %v322_v14 = vpop.f32.mrb[3].mxu0 }
  0xe9   :  { %v113_v16 = vpack.c.bf16 %v112_v13, %v112_v13 }
  0xeb   :  { %328 = vmatmul.mubr.msk.bf16.vlgmr.msra.gmra.mrb[0].mxu1 %vm137_vm2, %v113_v16 }
  0xec   :  { %332 = vmatpush3.bf16.msra.mxu1 %v348_v15  ;;  %335 = vmatprep.mubr.msk.bf16.mxu1 %vm379_vm0, %v378_v1 }
  0xed   :  { %333 = vmatprep.subr.bf16.mxu1 %v378_v1 }
  0xf0   :  { %334 = vmatpush3.bf16.msra.mxu1 %v349_v17 }
 0x1be   :  { %v175_v19 = vpop.f32.mrb[0].mxu1 }
 0x1bf   :  { %v176_v20 = vadd.f32 %v292_v18, %v175_v19  ;;  %v329_v21 = vpop.f32.mrb[1].mxu1 }
 0x1c0   :  { %v178_v22 = vpop.f32.mrb[2].mxu1 }
 0x1c1   :  { %v181_v23 = vmax.f32 %v176_v20, 0.0  ;;  %v330_v24 = vpop.f32.mrb[3].mxu1 }
 0x1c3   :  { %v182_v25 = vpack.c.bf16 %v181_v23, %v181_v23 }
 0x1c5   :  { %336 = vmatmul.mubr.msk.bf16.vlgmr.msra.gmra.mrb[4].mxu1 %vm137_vm2, %v182_v25 }
 0x298   :  { %v243_v27 = vpop.f32.mrb[4].mxu1 }
 0x299   :  { %v244_v28 = vadd.f32 %v296_v26, %v243_v27  ;;  %v337_v29 = vpop.f32.mrb[5].mxu1 }
 0x29a   :  { %v246_v30 = vpop.f32.mrb[6].mxu1 }
 0x29b   :  { %v254_v31 = vand.u32 2147483647, %v244_v28  ;;  %v338_v32 = vpop.f32.mrb[7].mxu1  ;;  %v251_v45 = vmax.f32 %v244_v28, 0.0  ;;  %vm252_vm5 = vcmp.ne.f32.partialorder %v244_v28, %v244_v28 }
 0x29d   :  { %v255_v33 = vsub.f32 0.0, %v254_v31 }
 0x29f   :  { %v256_v34 = vmul.f32 1.442695, %v255_v33 }
 0x2a1   :  { %350 = vpow2.f32 %v256_v34 }
 0x2ab   :  { %v351_v35 = vpop.eup %350 }
 0x2ac   :  { %v258_v36 = vadd.f32 1.0, %v351_v35  ;;  %v261_v37 = vmul.f32 -0.5, %v351_v35  ;;  %v264_v40 = vand.u32 2147483647, %v351_v35 }
 0x2ae   :  { %352 = vlog2.f32 %v258_v36  ;;  %v262_v39 = vadd.f32 1.0, %v261_v37  ;;  %vm265_vm3 = vcmp.lt.f32.partialorder %v264_v40, 0.0004427343 }
 0x2b0   :  { %v263_v44 = vmul.f32 %v351_v35, %v262_v39 }
 0x2b8   :  { %v353_v41 = vpop.eup %352 }
 0x2b9   :  { %v260_v43 = vmul.f32 0.6931472, %v353_v41 }
 0x2bb   :  { %v266_v46 = vsel %vm265_vm3, %v263_v44, %v260_v43 }
 0x2bc   :  { %v267_v47 = vadd.f32 %v266_v46, %v251_v45 }
 0x2be   :  { %v268_v48 = vsel %vm252_vm5, %v244_v28, %v267_v47 }
 0x2bf   :  { %v270_v49 = vsel %vm269_vm4, %v251_v45, %v268_v48 }
 0x2c0   :  { %271 = vst [vmem:[#allocation2] sm:$0xff] %v270_v49 }
 0x2c1   :  { %365 = shalt.err (!%p362_p4)
}
 0x2c2   :  { %s366_s23 = scalar_lea.hbm %s481_s7, 128 }
 0x2c3   :  { %p367_p5 = scmp.ne.s32.totalorder %s481_s7, %s366_s23  ;;  %p370_p6 = scmp.lt.u32.totalorder %s366_s23, %s481_s7 }
 0x2c5   :  { %p372_p7 = pnand %p370_p6, %p367_p5 }
 0x2c7   :  { %375 = shalt.err (!%p372_p7)
}
 0x2c8   :  { %281 = dma.vmem_to_hbm [thread:$0]  %s279_s5, 128, %s481_s7, [#allocation3]  }
 0x2c9   :  { %376 = dma.done.wait [#allocation3], 128  }
 0x2ca   :  { %377 = vsyncadd [#allocation3], 4294967168 }
 0x2cb   :  { %285 = vsyncpa [#allocation3], 1 }

</bundles_post_ra>
